<compile_context>
chip_gen: v5e
topology: v5e:2x2
jax: 0.10.0
libtpu: 0.0.40
codegen_flags: <defaults>
</compile_context>

<pallas_src>
import numpy as np
import jax
import jax.numpy as jnp
from jax.experimental import pallas as pl
from jax.experimental.pallas import tpu as pltpu

K = 3
STRIDE = 2
PAD = 1
OUT_PAD = 1


def _convt2_fused_kernel(xa_ref, xn_ref, w_ref, b_ref, o_ref):
    # xa_ref: (1, TH, W+1, Cin)   input rows t*TH .. t*TH+TH-1 (right col zero)
    # xn_ref: (1, 1,  W+1, Cin)   halo row t*TH+TH (zero row for the last tile)
    # w_ref : (4*Cin, 4*Coutp)    fused phase weights; rows [x00;x01;x10;x11],
    #                             cols [(p0,q0)|(p0,q1)|(p1,q0)|(p1,q1)]
    # b_ref : (1, 4*Coutp)        bias tiled over the four phases (f32)
    # o_ref : (1, TH*W, 4*Coutp)  one lane-dense output plane per row tile
    th = xa_ref.shape[1]
    w = xa_ref.shape[2] - 1
    cin = xa_ref.shape[3]
    m = th * w

    xa = xa_ref[0]                                    # (TH, W+1, Cin) rows m
    xn = xn_ref[0]                                    # (1,  W+1, Cin) row m+TH
    if th > 1:                                        # static branch
        xb = jnp.concatenate([xa[1:], xn], axis=0)    # rows m+1 (halo shift)
    else:
        xb = xn

    x00 = xa[:, :w, :]                                # x[m,   n  ]
    x01 = xa[:, 1:, :]                                # x[m,   n+1]
    x10 = xb[:, :w, :]                                # x[m+1, n  ]
    x11 = xb[:, 1:, :]                                # x[m+1, n+1]

    # Taps along the contraction axis -> ONE wide-K MXU matmul per grid step.
    # TODO(synk): for very small Cin the lane-axis concat is a relayout; a
    # wrapper-side tap pre-pack (or pltpu.roll for the column shift) would keep
    # tiny layers MXU-bound at the cost of 4x input HBM bytes.
    p = jnp.concatenate([x00, x01, x10, x11], axis=-1).reshape(m, 4 * cin)

    r = jnp.dot(p, w_ref[...], preferred_element_type=jnp.float32)
    r = r + b_ref[...].astype(jnp.float32)
    o_ref[0] = jnp.maximum(r, 0.0).astype(o_ref.dtype)


def _vmem_capacity_bytes():
    try:
        info = pltpu.get_tpu_info()
        cap = getattr(info, "vmem_capacity_bytes", None)
        if cap:
            return int(cap)
    except Exception:
        pass
    return 128 * 2 ** 20


def _pick_row_tile(H, W, per_step_bytes, step_budget, require_two_tiles):
    """Largest row tile TH that divides H, keeps the output block's sublane dim
    (TH*W) a multiple of 8 (or the full frame), fits the per-step VMEM budget
    and, when required (batch==1 on a 2-TC part), leaves >= 2 row tiles."""
    cands = [d for d in range(1, H + 1)
             if H % d == 0 and (d == H or (d * W) % 8 == 0)]
    if require_two_tiles and H >= 2:
        halved = [d for d in cands if d <= (H + 1) // 2]
        if halved:
            cands = halved
    fitting = [d for d in cands if per_step_bytes(d) <= step_budget]
    if fitting:
        return max(fitting)
    return min(cands)     # smallest legal tile; vmem_limit is scaled to it


def unet_convt2_forward(x_nchw, weight, bias, *, use_bf16=False):
    """Forward of unetConvT2: ConvTranspose2d(3, stride=2, pad=1, out_pad=1) + ReLU.

    x_nchw : (N, Cin, H, W)    float32
    weight : (Cin, Cout, 3, 3) (PyTorch ConvTranspose2d layout)
    bias   : (Cout,)
    returns: (N, Cout, 2H, 2W)
    """
    N, Cin, H, W = x_nchw.shape
    _, Cout, KH, KW = weight.shape
    assert (KH, KW) == (K, K)
    Hout, Wout = 2 * H, 2 * W

    cdtype = jnp.bfloat16 if use_bf16 else x_nchw.dtype
    in_isz = jnp.dtype(cdtype).itemsize
    out_dtype = x_nchw.dtype
    out_isz = jnp.dtype(out_dtype).itemsize

    # Pad Cout so the output lane dim (4*Coutp) is a multiple of 128 -> fully
    # unmasked stores.  Padded channels carry zero weights/bias.
    Coutp = max(32, -(-Cout // 32) * 32)
    lane = 4 * Coutp

    # ---- glue: NCHW -> channels-last, one zero row/col at bottom/right -------
    # (These boundary transposes are pure PyTorch-interface glue; a full NHWC
    # pipeline would drop them.)
    x = jnp.transpose(x_nchw, (0, 2, 3, 1)).astype(cdtype)       # (N, H, W, Cin)
    xpad = jnp.pad(x, ((0, 0), (0, 1), (0, 1), (0, 0)))          # (N, H+1, W+1, Cin)
    xa = xpad[:, :H]                                             # rows m

    # ---- glue: fused phase-decomposed weight matrix ---------------------------
    Wt = jnp.transpose(weight, (2, 3, 0, 1)).astype(cdtype)      # (kh, kw, Cin, Cout)

    def _pc(blk):  # (Cin, Cout) -> (Cin, Coutp) with zero channel padding
        return jnp.pad(blk, ((0, 0), (0, Coutp - Cout)))

    z = jnp.zeros((Cin, Coutp), cdtype)
    # rows: [x00; x01; x10; x11]   cols: [(p0,q0) | (p0,q1) | (p1,q0) | (p1,q1)]
    w_fused = jnp.concatenate([
        jnp.concatenate([_pc(Wt[1, 1]), _pc(Wt[1, 2]), _pc(Wt[2, 1]), _pc(Wt[2, 2])], axis=1),
        jnp.concatenate([z,             _pc(Wt[1, 0]), z,             _pc(Wt[2, 0])], axis=1),
        jnp.concatenate([z,             z,             _pc(Wt[0, 1]), _pc(Wt[0, 2])], axis=1),
        jnp.concatenate([z,             z,             z,             _pc(Wt[0, 0])], axis=1),
    ], axis=0)                                                   # (4*Cin, 4*Coutp)
    bias_p = jnp.pad(bias.astype(jnp.float32), (0, Coutp - Cout))
    b4 = jnp.tile(bias_p, 4).reshape(1, lane)                    # (1, 4*Coutp)

    # ---- generation-aware tiling & VMEM budget --------------------------------
    vmem_cap = _vmem_capacity_bytes()
    if vmem_cap >= 96 * 2 ** 20:        # v5e / v6e class: 128 MiB physical VMEM
        step_budget = 40 * 2 ** 20
        vmem_limit_cap = 100 * 2 ** 20
    else:                               # v7x class: 64 MiB physical -> headroom
        step_budget = 20 * 2 ** 20
        vmem_limit_cap = 48 * 2 ** 20

    def per_step_bytes(th):
        xa_t = th * (W + 1) * Cin * in_isz           # input row tile
        xn_t = (W + 1) * Cin * in_isz                # halo row
        out_t = th * W * lane * out_isz              # output tile
        wgt = 4 * Cin * lane * in_isz + lane * 4     # weights + bias
        tmp = (th * (W + 1) * Cin * in_isz           # xb (halo-shifted rows)
               + 2 * th * W * 4 * Cin * in_isz       # tap slices + packed patch
               + 2 * th * W * lane * 4)              # f32 result + epilogue
        # BlockSpec double-buffers every operand (incl. constant-index blocks).
        return 2 * (xa_t + xn_t + out_t + wgt) + tmp

    # Only force >= 2 row tiles when batch == 1 (otherwise the batch grid axis
    # already feeds both v7x TensorCores; on v5e/v6e the split is overhead).
    TH = _pick_row_tile(H, W, per_step_bytes, step_budget,
                        require_two_tiles=(N == 1))
    need = per_step_bytes(TH)
    vmem_limit = int(min(vmem_limit_cap, max(32 * 2 ** 20, 2 * need)))

    # Halo rows: xnext[n, t] = xpad[n, (t+1)*TH]  (last one is the zero row).
    xnext = xpad[:, TH::TH]                                      # (N, H//TH, W+1, Cin)

    flops = 2 * N * H * W * (4 * Cin) * lane
    bytes_accessed = int(xa.size * in_isz + xnext.size * in_isz
                         + w_fused.size * in_isz + b4.size * 4
                         + N * H * W * lane * out_isz)

    out = pl.pallas_call(
        _convt2_fused_kernel,
        out_shape=jax.ShapeDtypeStruct((N, H * W, lane), out_dtype),
        grid_spec=pltpu.PrefetchScalarGridSpec(
            num_scalar_prefetch=0,
            grid=(N, H // TH),
            in_specs=[
                pl.BlockSpec((1, TH, W + 1, Cin), lambda n, t: (n, t, 0, 0)),
                pl.BlockSpec((1, 1, W + 1, Cin), lambda n, t: (n, t, 0, 0)),
                pl.BlockSpec((4 * Cin, lane), lambda n, t: (0, 0)),
                pl.BlockSpec((1, lane), lambda n, t: (0, 0)),
            ],
            out_specs=pl.BlockSpec((1, TH * W, lane), lambda n, t: (n, t, 0)),
        ),
        compiler_params=pltpu.CompilerParams(
            dimension_semantics=("parallel", "parallel"),
            vmem_limit_bytes=vmem_limit,
        ),
        cost_estimate=pl.CostEstimate(
            flops=flops, transcendentals=0, bytes_accessed=bytes_accessed),
    )(xa, xnext, w_fused, b4)

    # ---- glue: de-interleave (p, q) phases, drop channel pad, restore NCHW ----
    out = out.reshape(N, H, W, 2, 2, Coutp)[..., :Cout]   # (n, m, w, p, q, co)
    out = jnp.transpose(out, (0, 5, 1, 3, 2, 4))          # (n, co, m, p, w, q)
    return out.reshape(N, Cout, Hout, Wout)               # NCHW


def _ref_convt2_relu(x, w, b):
    """Independent numpy reference of PyTorch ConvTranspose2d + ReLU (scatter form)."""
    x = np.asarray(x); w = np.asarray(w); b = np.asarray(b)
    N, Cin, H, W = x.shape
    _, Cout, Kh, Kw = w.shape
    Hout = (H - 1) * STRIDE - 2 * PAD + Kh + OUT_PAD
    Wout = (W - 1) * STRIDE - 2 * PAD + Kw + OUT_PAD
    y = np.zeros((N, Cout, Hout, Wout), np.float32)
    for n in range(N):
        for ci in range(Cin):
            for ih in range(H):
                for iw in range(W):
                    oh0 = ih * STRIDE - PAD
                    ow0 = iw * STRIDE - PAD
                    for kh in range(Kh):
                        for kw in range(Kw):
                            oh, ow = oh0 + kh, ow0 + kw
                            if 0 <= oh < Hout and 0 <= ow < Wout:
                                y[n, :, oh, ow] += x[n, ci, ih, iw] * w[ci, :, kh, kw]
    y += b[None, :, None, None]
    return np.maximum(y, 0.0)


def _run_case(key, N, Cin, Cout, H, W):
    k_w, k_b, k_x = jax.random.split(key, 3)
    fan_in = Cout * K * K
    bound = 1.0 / np.sqrt(fan_in)
    weight = jax.random.uniform(k_w, (Cin, Cout, K, K), jnp.float32, -bound, bound)
    bias = jax.random.uniform(k_b, (Cout,), jnp.float32, -bound, bound)
    x = jax.random.normal(k_x, (N, Cin, H, W), jnp.float32)

    out = unet_convt2_forward(x, weight, bias)
    out = jax.block_until_ready(out)

    ref = _ref_convt2_relu(x, weight, bias)
    assert out.shape == (N, Cout, 2 * H, 2 * W), out.shape
    np.testing.assert_allclose(np.asarray(out), ref, rtol=1e-4, atol=1e-4)


if __name__ == "__main__":
    key = jax.random.PRNGKey(0)
    k1, k2 = jax.random.split(key)

    # Main test shape (matches the module's intended small-scale usage).
    _run_case(k1, N=2, Cin=4, Cout=8, H=16, W=16)
    # Odd / non-aligned shape: batch=1 (exercises the two-tile rule), odd
    # channels (exercises Cout lane padding) and a non-multiple-of-8 width.
    _run_case(k2, N=1, Cin=3, Cout=5, H=6, W=7)

    print("KERNEL_OK")
</pallas_src>

<mosaic_0001>
module attributes {stable_mosaic.version = 11 : i64} {
  func.func @_convt2_fused_kernel(%arg0: i32, %arg1: i32, %arg2: memref<1x16x17x4xf32, #tpu.memory_space<vmem>>, %arg3: memref<1x1x17x4xf32, #tpu.memory_space<vmem>>, %arg4: memref<16x128xf32, #tpu.memory_space<vmem>>, %arg5: memref<1x128xf32, #tpu.memory_space<vmem>>, %arg6: memref<1x256x128xf32, #tpu.memory_space<vmem>>) attributes {dimension_semantics = [#tpu.dimension_semantics<parallel>, #tpu.dimension_semantics<parallel>], iteration_bounds = array<i64: 2, 1>, scalar_prefetch = 0 : i64, scratch_operands = 0 : i64, tpu.core_type = #tpu.core_type<tc>, window_params = [{transform_indices = @transform_0, window_bounds = array<i64: 1, 16, 17, 4>}, {transform_indices = @transform_1, window_bounds = array<i64: 1, 1, 17, 4>}, {pipeline_mode = #tpu.pipeline_mode<synchronous>, transform_indices = @transform_2, window_bounds = array<i64: 16, 128>}, {pipeline_mode = #tpu.pipeline_mode<synchronous>, transform_indices = @transform_3, window_bounds = array<i64: 1, 128>}, {transform_indices = @transform_4, window_bounds = array<i64: 1, 256, 128>}]} {
    %c0 = arith.constant 0 : index
    %c0_0 = arith.constant 0 : index
    %c0_1 = arith.constant 0 : index
    %c0_2 = arith.constant 0 : index
    %0 = vector.load %arg2[%c0, %c0_0, %c0_1, %c0_2] : memref<1x16x17x4xf32, #tpu.memory_space<vmem>>, vector<1x16x17x4xf32>
    %1 = vector.shape_cast %0 : vector<1x16x17x4xf32> to vector<16x17x4xf32>
    %c0_3 = arith.constant 0 : index
    %c0_4 = arith.constant 0 : index
    %c0_5 = arith.constant 0 : index
    %c0_6 = arith.constant 0 : index
    %2 = vector.load %arg3[%c0_3, %c0_4, %c0_5, %c0_6] : memref<1x1x17x4xf32, #tpu.memory_space<vmem>>, vector<1x1x17x4xf32>
    %3 = vector.shape_cast %2 : vector<1x1x17x4xf32> to vector<1x17x4xf32>
    %4 = vector.extract_strided_slice %1 {offsets = [1, 0, 0], sizes = [15, 17, 4], strides = [1, 1, 1]} : vector<16x17x4xf32> to vector<15x17x4xf32>
    %5 = tpu.concatenate %4, %3 in 0 : vector<15x17x4xf32>, vector<1x17x4xf32> -> vector<16x17x4xf32>
    %6 = vector.extract_strided_slice %1 {offsets = [0, 0, 0], sizes = [16, 16, 4], strides = [1, 1, 1]} : vector<16x17x4xf32> to vector<16x16x4xf32>
    %7 = vector.extract_strided_slice %1 {offsets = [0, 1, 0], sizes = [16, 16, 4], strides = [1, 1, 1]} : vector<16x17x4xf32> to vector<16x16x4xf32>
    %8 = vector.extract_strided_slice %5 {offsets = [0, 0, 0], sizes = [16, 16, 4], strides = [1, 1, 1]} : vector<16x17x4xf32> to vector<16x16x4xf32>
    %9 = vector.extract_strided_slice %5 {offsets = [0, 1, 0], sizes = [16, 16, 4], strides = [1, 1, 1]} : vector<16x17x4xf32> to vector<16x16x4xf32>
    %10 = tpu.concatenate %6, %7, %8, %9 in 2 : vector<16x16x4xf32>, vector<16x16x4xf32>, vector<16x16x4xf32>, vector<16x16x4xf32> -> vector<16x16x16xf32>
    %11 = vector.shape_cast %10 : vector<16x16x16xf32> to vector<256x16xf32>
    %c0_7 = arith.constant 0 : index
    %c0_8 = arith.constant 0 : index
    %12 = vector.load %arg4[%c0_7, %c0_8] : memref<16x128xf32, #tpu.memory_space<vmem>>, vector<16x128xf32>
    %cst = arith.constant dense<0.000000e+00> : vector<256x128xf32>
    %13 = tpu.matmul %11, %12, %cst {dimension_numbers = #tpu.dot_dimension_numbers<[1], [0], [0], [1], [0, 0, 1, 1], [], []>} : vector<256x16xf32>, vector<16x128xf32>, vector<256x128xf32> -> vector<256x128xf32>
    %c0_9 = arith.constant 0 : index
    %c0_10 = arith.constant 0 : index
    %14 = vector.load %arg5[%c0_9, %c0_10] : memref<1x128xf32, #tpu.memory_space<vmem>>, vector<1x128xf32>
    %15 = vector.broadcast %14 : vector<1x128xf32> to vector<256x128xf32>
    %16 = arith.addf %13, %15 : vector<256x128xf32>
    %cst_11 = arith.constant 0.000000e+00 : f32
    %17 = vector.broadcast %cst_11 : f32 to vector<256x128xf32>
    %18 = arith.maximumf %16, %17 : vector<256x128xf32>
    %c0_12 = arith.constant 0 : index
    %c0_13 = arith.constant 0 : index
    %c0_14 = arith.constant 0 : index
    %19 = vector.load %arg6[%c0_12, %c0_13, %c0_14] : memref<1x256x128xf32, #tpu.memory_space<vmem>>, vector<1x256x128xf32>
    %20 = vector.shape_cast %19 : vector<1x256x128xf32> to vector<256x128xf32>
    %21 = vector.shape_cast %18 : vector<256x128xf32> to vector<1x256x128xf32>
    tpu.vector_store %arg6[%c0_12, %c0_13, %c0_14], %21 {strides = array<i32>} : memref<1x256x128xf32, #tpu.memory_space<vmem>>, vector<1x256x128xf32>,
    return
  }
  func.func @transform_0(%arg0: i32, %arg1: i32) -> (i32, i32, i32, i32) {
    %c0_i32 = arith.constant 0 : i32
    %c0_i32_0 = arith.constant 0 : i32
    %c0_i32_1 = arith.constant 0 : i32
    return %arg0, %arg1, %c0_i32, %c0_i32_0 : i32, i32, i32, i32
  }
  func.func @transform_1(%arg0: i32, %arg1: i32) -> (i32, i32, i32, i32) {
    %c0_i32 = arith.constant 0 : i32
    %c0_i32_0 = arith.constant 0 : i32
    %c0_i32_1 = arith.constant 0 : i32
    return %arg0, %arg1, %c0_i32, %c0_i32_0 : i32, i32, i32, i32
  }
  func.func @transform_2(%arg0: i32, %arg1: i32) -> (i32, i32) {
    %c0_i32 = arith.constant 0 : i32
    %c0_i32_0 = arith.constant 0 : i32
    %c0_i32_1 = arith.constant 0 : i32
    return %c0_i32, %c0_i32_0 : i32, i32
  }
  func.func @transform_3(%arg0: i32, %arg1: i32) -> (i32, i32) {
    %c0_i32 = arith.constant 0 : i32
    %c0_i32_0 = arith.constant 0 : i32
    %c0_i32_1 = arith.constant 0 : i32
    return %c0_i32, %c0_i32_0 : i32, i32
  }
  func.func @transform_4(%arg0: i32, %arg1: i32) -> (i32, i32, i32) {
    %c0_i32 = arith.constant 0 : i32
    %c0_i32_0 = arith.constant 0 : i32
    return %arg0, %arg1, %c0_i32 : i32, i32, i32
  }
}

</mosaic_0001>

<bundles_post_ra>
// kernel: tpu_custom_call.1
= control target key start
LH: loop header
LB: loop body
LE: loop exit
PB: predicated region body
PF: predicated region fallthrough
CT: control target
= control target key end

     0   :  { %9 = vsyncpa [#allocation3], 0  ;;  %s2258_s0 = inlined_call_operand.vmem [shape: f32[2,16,17,4], index: 0, kind: input, shape index: {}]   ;;  %s2259_s1 = inlined_call_operand.vmem [shape: f32[2,1,17,4], index: 1, kind: input, shape index: {}]   ;;  %s2260_s2 = inlined_call_operand.vmem [shape: f32[16,128], index: 2, kind: input, shape index: {}]   ;;  %s2261_s3 = inlined_call_operand.vmem [shape: f32[1,128], index: 3, kind: input, shape index: {}]   ;;  %s2262_s4 = inlined_call_operand.hbm [shape: f32[2,256,128], index: 4, kind: output, shape index: {}]  }
   0x1   :  { %11 = vsyncpa [#allocation3 + $0x1], 0  ;;  %s1463_s15 = smov 0   ;;  %s1465_s16 = smov 0  }
   0x2   :  { %s1467_s17 = smov 0   ;;  %s1469_s18 = smov 0  }
   0x3   :  { %s1471_s19 = smov 0   ;;  %s1473_s20 = smov 0  }
   0x4 LB: > { %s1240_s21 = sadd.s32 4294967295, %s1432_s20   ;;  %s1241_s22 = sadd.s32 4294967294, %s1432_s20   ;;  %s1432_s20 = sphi %s1473_s20, %s17_s20   ;;  %s1428_s19 = sphi %s1471_s19, %s2299_s19   ;;  %s1424_s18 = sphi %s1469_s18, %s2298_s18   ;;  %s1420_s17 = sphi %s1467_s17, %s2297_s17   ;;  %s1416_s16 = sphi %s1465_s16, %s2296_s16   ;;  %s1412_s15 = sphi %s1463_s15, %s2295_s15  }
   0x5   : > { %s29_s23 = sadd.s32 1, %s1428_s19  ;;  %s136_s24 = sadd.s32 1, %s1420_s17 }
   0x6   : > { %p31_p0 = scmp.ge.s32.totalorder %s29_s23, 2  ;;  %p146_p1 = scmp.ne.s32.totalorder %s1420_s17, %s1416_s16 }
   0x7   : > { %p147_p2 = scmp.eq.s32.totalorder %s1240_s21, 1  ;;  %p152_p3 = scmp.ne.s32.totalorder %s1416_s16, %s1412_s15 }
   0x8   : > { %s2301_s23 = smov (%p31_p0, %s29_s23), 0  ;;  %p153_p5 = scmp.eq.s32.totalorder %s1241_s22, 1 }
   0x9   : > { %p1503_p4 = por %p147_p2, %p146_p1  ;;  %s131_s26 = ssub.s32 %s1428_s19, %s2301_s23 }
   0xa   : > { %p1244_p6 = scmp.ge.s32.totalorder %s1432_s20, 1  ;;  %p134_p7 = scmp.eq.s32.totalorder %s131_s26, 0 }
   0xb   : > { %p1510_p8 = por %p153_p5, %p152_p3  ;;  %p203_p9 = scmp.lt.s32.totalorder %s1432_s20, 3 }
   0xc   : > { %s1516_s28 = scalar_select %p134_p7, %s1420_s17, %s136_s24  }
   0xd   : > { %p204_p10 = pnand %p1244_p6, %p203_p9 }
   0xf   : > { %207 = sbr.rel (%p204_p10) target bundleno = 532 (0x214), region = 36 }
  0x14   : > { %p244_p11 = scmp.lt.s32.totalorder %s1424_s18, 1  ;;  %vm363_vm0 = vcmask 1046528   ;;  %s1434_s8 = smov 4   ;;  %vm740_vm1 = vcmask 31744   ;;  %vm773_vm2 = vcmask 64512   ;;  %vm806_vm3 = vcmask 97280  }
  0x15   : > { %s1435_s9 = smov 8   ;;  %s1436_s10 = smov 12   ;;  %vm845_vm4 = vcmask 130048  }
  0x16   : > { %s1520_s29 = scalar_select %p244_p11, %s1424_s18, 1 }
  0x18   : > { %s1292_s30 = smul.u32 384, %s1520_s29 }
  0x19   : > { %s1293_s21 = smul.u32 24, %s1520_s29  ;;  %s240_s29 = sand.u32 1, %s1416_s16  }
  0x1a   : > { %s1526_s7 = scalar_lea.vmem %s2258_s0, %s1292_s30  ;;  %s1245_s6 = sshll.u32 %s240_s29, 8 }
  0x1b   : > { %v1529_v0 = vld [vmem:[%s1526_s7 + $0x30] sm:$0xff]  ;;  %v1532_v1 = vld [vmem:[%s1526_s7 + $0x38] sm:$0xff]  ;;  %v1540_v5 = vld [vmem:[%s1526_s7 + $0x20] sm:$0xff]  ;;  %s1958_s26 = scalar_lea.vmem %s2259_s1, %s1293_s21  ;;  %s1120_s14 = scalar_lea.sflag [#allocation3], %s240_s29 }
  0x1c   : > { %2271 = vst [vmem:[#allocation5_spill] sm:$0xff] %v1532_v1  ;;  %v1535_v2 = vld [vmem:[%s1526_s7 + $0x18] sm:$0xff]  ;;  %v374_v3 = vrot.slane %v1529_v0, 1  ;;  %v375_v4 = vrot.slane %v1532_v1, 1  ;;  %v1544_v7 = vld [vmem:[%s1526_s7] sm:$0xff]  ;;  %v1547_v8 = vld [vmem:[%s1526_s7 + $0x8] sm:$0xff] }
  0x1d   : > { %v369_v6 = vrot.slane %v1535_v2, 1  ;;  %v370_v9 = vrot.slane %v1540_v5, 1  ;;  %v364_v10 = vrot.slane %v1544_v7, 1  ;;  %v365_v11 = vrot.slane %v1547_v8, 1  ;;  %v272_v12 = vld [vmem:[%s1526_s7 + $0x40] sm:$0x1] }
  0x1e   : > { %v1554_v13 = vsel %vm363_vm0, %v374_v3, %v375_v4  ;;  %v269_v14 = vld [vmem:[%s1526_s7 + $0x28] sm:$0x1]  ;;  %v266_v15 = vld [vmem:[%s1526_s7 + $0x10] sm:$0x1]  ;;  %v377_v18 = vrot.slane %v272_v12, 1  ;;  %v1575_v24 = vld [vmem:[%s1526_s7 + $0x60] sm:$0xff] }
  0x1f   : > { %452 = vrot.lane.b32.xlu2 %v1554_v13, %s1434_s8  ;;  %v1561_v16 = vsel %vm363_vm0, %v369_v6, %v370_v9  ;;  %v366_v17 = vsel %vm363_vm0, %v364_v10, %v365_v11  ;;  %v372_v19 = vrot.slane %v269_v14, 1  ;;  %v367_v20 = vrot.slane %v266_v15, 1  ;;  %v1578_v25 = vld [vmem:[%s1526_s7 + $0x68] sm:$0xff]  ;;  %v1581_v26 = vld [vmem:[%s1526_s7 + $0x50] sm:$0xff]  ;;  %v275_v27 = vld [vmem:[%s1526_s7 + $0x58] sm:$0x1] }
  0x20   : > { %448 = vrot.lane.b32.xlu1 %v1561_v16, %s1434_s8  ;;  %444 = vrot.lane.b32.xlu0 %v366_v17, %s1434_s8  ;;  %v1568_v21 = vsel %vm363_vm0, %v375_v4, %v377_v18  ;;  %v1585_v28 = vld [vmem:[%s1526_s7 + $0x48] sm:$0xff]  ;;  %v384_v29 = vrot.slane %v1575_v24, 1  ;;  %v385_v30 = vrot.slane %v1578_v25, 1  ;;  %v380_v31 = vrot.slane %v1581_v26, 1  ;;  %v1606_v37 = vld [vmem:[%s1526_s7 + $0x80] sm:$0xff]  ;;  %s1374_s30 = scalar_lea.hbm %s2262_s4, 512 }
  0x21   : > { %v1571_v22 = vsel %vm363_vm0, %v370_v9, %v372_v19  ;;  %v368_v23 = vsel %vm363_vm0, %v365_v11, %v367_v20  ;;  %2272 = vst [vmem:[#allocation6_spill] sm:$0xff] %v1585_v28  ;;  %v382_v32 = vrot.slane %v275_v27, 1  ;;  %v379_v33 = vrot.slane %v1585_v28, 1  ;;  %v281_v38 = vld [vmem:[%s1526_s7 + $0x88] sm:$0x1]  ;;  %v1610_v39 = vld [vmem:[%s1526_s7 + $0x78] sm:$0xff] }
  0x22   : > { %v1597_v34 = vsel %vm363_vm0, %v384_v29, %v385_v30  ;;  %v278_v40 = vld [vmem:[%s1526_s7 + $0x70] sm:$0x1]  ;;  %v390_v41 = vrot.slane %v1606_v37, 1  ;;  %v392_v42 = vrot.slane %v281_v38, 1  ;;  %v389_v43 = vrot.slane %v1610_v39, 1  ;;  %v1631_v48 = vld [vmem:[%s1526_s7 + $0xa8] sm:$0xff] }
  0x23   : > { %v1600_v35 = vsel %vm363_vm0, %v380_v31, %v382_v32  ;;  %v1603_v36 = vsel %vm363_vm0, %v379_v33, %v380_v31  ;;  %v387_v44 = vrot.slane %v278_v40, 1  ;;  %2273 = vst [vmem:[#allocation7_spill] sm:$0xff] %v1631_v48  ;;  %v1634_v49 = vld [vmem:[%s1526_s7 + $0xb0] sm:$0xff]  ;;  %v1637_v50 = vld [vmem:[%s1526_s7 + $0x98] sm:$0xff]  ;;  %v284_v51 = vld [vmem:[%s1526_s7 + $0xa0] sm:$0x1] }
  0x24   : > { %v1622_v45 = vsel %vm363_vm0, %v390_v41, %v392_v42  ;;  %v1625_v46 = vsel %vm363_vm0, %v389_v43, %v390_v41  ;;  %2274 = vst [vmem:[#allocation8_spill] sm:$0xff] %v1637_v50  ;;  %v1641_v52 = vld [vmem:[%s1526_s7 + $0x90] sm:$0xff]  ;;  %v399_v53 = vrot.slane %v1631_v48, 1  ;;  %v400_v54 = vrot.slane %v1634_v49, 1  ;;  %v1663_v61 = vld [vmem:[%s1526_s7 + $0xc8] sm:$0xff]  ;;  %v1667_v63 = vld [vmem:[%s1526_s7 + $0xc0] sm:$0xff] }
  0x25   : > { %v1628_v47 = vsel %vm363_vm0, %v385_v30, %v387_v44  ;;  %v395_v55 = vrot.slane %v1637_v50, 1  ;;  %v397_v56 = vrot.slane %v284_v51, 1  ;;  %v394_v57 = vrot.slane %v1641_v52, 1  ;;  %v290_v62 = vld [vmem:[%s1526_s7 + $0xd0] sm:$0x1]  ;;  %v1688_v15 = vld [vmem:[%s1526_s7 + $0x120] sm:$0xff] }
  0x26   : > { %v1654_v58 = vsel %vm363_vm0, %v399_v53, %v400_v54  ;;  %v287_v3 = vld [vmem:[%s1526_s7 + $0xb8] sm:$0x1]  ;;  %v405_v4 = vrot.slane %v1663_v61, 1  ;;  %v407_v6 = vrot.slane %v290_v62, 1  ;;  %v404_v9 = vrot.slane %v1667_v63, 1  ;;  %v1691_v17 = vld [vmem:[%s1526_s7 + $0x128] sm:$0xff] }
  0x27   : > { %454 = vrot.lane.b32.xlu2 %v1568_v21, %s1434_s8  ;;  %v1657_v59 = vsel %vm363_vm0, %v395_v55, %v397_v56  ;;  %v1660_v60 = vsel %vm363_vm0, %v394_v57, %v395_v55  ;;  %v402_v10 = vrot.slane %v287_v3, 1  ;;  %v424_v18 = vrot.slane %v1688_v15, 1  ;;  %v1702_v20 = vld [vmem:[%s1526_s7 + $0x138] sm:$0xff]  ;;  %v1711_v29 = vld [vmem:[%s1526_s7 + $0x140] sm:$0xff]  ;;  %v302_v42 = vld [vmem:[%s1526_s7 + $0x130] sm:$0x1] }
  0x28   : > { %450 = vrot.lane.b32.xlu1 %v1571_v22, %s1434_s8  ;;  %446 = vrot.lane.b32.xlu0 %v368_v23, %s1434_s8  ;;  %v1679_v11 = vsel %vm363_vm0, %v405_v4, %v407_v6  ;;  %v1682_v12 = vsel %vm363_vm0, %v404_v9, %v405_v4  ;;  %v425_v19 = vrot.slane %v1691_v17, 1  ;;  %v1705_v23 = vld [vmem:[%s1526_s7 + $0xd8] sm:$0xff]  ;;  %v1714_v30 = vld [vmem:[%s1526_s7 + $0xe0] sm:$0xff]  ;;  %v429_v31 = vrot.slane %v1702_v20, 1 }
  0x29   : > { %v1685_v14 = vsel %vm363_vm0, %v400_v54, %v402_v10  ;;  %v409_v32 = vrot.slane %v1705_v23, 1  ;;  %v430_v33 = vrot.slane %v1711_v29, 1  ;;  %v410_v38 = vrot.slane %v1714_v30, 1  ;;  %v305_v51 = vld [vmem:[%s1526_s7 + $0x148] sm:$0x1]  ;;  %v1763_v57 = vld [vmem:[%s1526_s7 + $0xf0] sm:$0xff] }
  0x2a   : > { %v1708_v27 = vsel %vm363_vm0, %v424_v18, %v425_v19  ;;  %v427_v43 = vrot.slane %v302_v42, 1  ;;  %v293_v53 = vld [vmem:[%s1526_s7 + $0xe8] sm:$0x1]  ;;  %v1766_v62 = vld [vmem:[%s1526_s7 + $0x150] sm:$0xff]  ;;  %v1769_v3 = vld [vmem:[%s1526_s7 + $0x158] sm:$0xff]  ;;  %v414_v10 = vrot.slane %v1763_v57, 1 }
  0x2b   : > { %v431_v40 = vsel %vm363_vm0, %v429_v31, %v430_v33  ;;  %v411_v41 = vsel %vm363_vm0, %v409_v32, %v410_v38  ;;  %v412_v54 = vrot.slane %v293_v53, 1  ;;  %v1772_v4 = vld [vmem:[%s1526_s7 + $0xf8] sm:$0xff]  ;;  %v434_v6 = vrot.slane %v1766_v62, 1  ;;  %v840_v42 = vld [vmem:[%s2260_s2 + $0x8] sm:$0xff] }
  0x2c   : > { %v1734_v44 = vsel %vm363_vm0, %v425_v19, %v427_v43  ;;  %v435_v9 = vrot.slane %v1769_v3, 1  ;;  %v415_v19 = vrot.slane %v1772_v4, 1  ;;  %956 = vmatpush.msra.mxu0 %v840_v42  ;;  %1287 = vmatpush.msra.mxu2 %v840_v42 }
  0x2d   : > { %v413_v56 = vsel %vm363_vm0, %v410_v38, %v412_v54  ;;  %1288 = vmatpush.msra.mxu3 %v840_v42  ;;  %1286 = vmatpush.msra.mxu1 %v840_v42 }
  0x2e   : > { %v436_v31 = vsel %vm363_vm0, %v434_v6, %v435_v9  ;;  %v416_v32 = vsel %vm363_vm0, %v414_v10, %v415_v19 }
  0x2f   : > { %460 = vrot.lane.b32.xlu2 %v1597_v34, %s1434_s8 }
  0x30   : > { %458 = vrot.lane.b32.xlu1 %v1600_v35, %s1434_s8  ;;  %456 = vrot.lane.b32.xlu0 %v1603_v36, %s1434_s8 }
  0x37   : > { %466 = vrot.lane.b32.xlu2 %v1622_v45, %s1434_s8 }
  0x38   : > { %464 = vrot.lane.b32.xlu1 %v1625_v46, %s1434_s8  ;;  %462 = vrot.lane.b32.xlu0 %v1628_v47, %s1434_s8 }
  0x3f   : > { %472 = vrot.lane.b32.xlu2 %v1654_v58, %s1434_s8 }
  0x40   : > { %470 = vrot.lane.b32.xlu1 %v1657_v59, %s1434_s8  ;;  %468 = vrot.lane.b32.xlu0 %v1660_v60, %s1434_s8 }
  0x47   : > { %478 = vrot.lane.b32.xlu2 %v1679_v11, %s1434_s8 }
  0x48   : > { %476 = vrot.lane.b32.xlu1 %v1682_v12, %s1434_s8  ;;  %474 = vrot.lane.b32.xlu0 %v1685_v14, %s1434_s8 }
  0x4f   : > { %590 = vrot.lane.b32.xlu2 %v1702_v20, %s1435_s9 }
  0x50   : > { %574 = vrot.lane.b32.xlu1 %v1705_v23, %s1435_s9  ;;  %492 = vrot.lane.b32.xlu0 %v1708_v27, %s1434_s8 }
  0x57   : > { %542 = vrot.lane.b32.xlu2 %v1535_v2, %s1435_s9 }
  0x58   : > { %692 = vrot.lane.b32.xlu1 %v431_v40, %s1436_s10  ;;  %676 = vrot.lane.b32.xlu0 %v411_v41, %s1436_s10 }
  0x5f   : > { %644 = vrot.lane.b32.xlu2 %v1561_v16, %s1436_s10  ;;  %v432_v16 = vrot.slane %v305_v51, 1 }
  0x60   : > { %494 = vrot.lane.b32.xlu1 %v1734_v44, %s1434_s8  ;;  %558 = vrot.lane.b32.xlu0 %v1610_v39, %s1435_s9 }
  0x61   : > { %v433_v55 = vsel %vm363_vm0, %v430_v33, %v432_v16  ;;  %v308_v16 = vld [vmem:[%s1526_s7 + $0x160] sm:$0x1] }
  0x67   : > { %592 = vrot.lane.b32.xlu2 %v1711_v29, %s1435_s9 }
  0x68   : > { %576 = vrot.lane.b32.xlu1 %v1714_v30, %s1435_s9  ;;  %660 = vrot.lane.b32.xlu0 %v1625_v46, %s1436_s10 }
  0x6f   : > { %544 = vrot.lane.b32.xlu2 %v1540_v5, %s1435_s9 }
  0x70   : > { %694 = vrot.lane.b32.xlu1 %v433_v55, %s1436_s10  ;;  %678 = vrot.lane.b32.xlu0 %v413_v56, %s1436_s10 }
  0x77   : > { %496 = vrot.lane.b32.xlu2 %v431_v40, %s1434_s8  ;;  %v296_v40 = vld [vmem:[%s1526_s7 + $0x100] sm:$0x1] }
  0x78   : > { %480 = vrot.lane.b32.xlu1 %v411_v41, %s1434_s8  ;;  %560 = vrot.lane.b32.xlu0 %v1606_v37, %s1435_s9  ;;  %v417_v41 = vrot.slane %v296_v40, 1 }
  0x79   : > { %v1760_v46 = vpop.permute.xlu2 %452 }
  0x7f   : > { %578 = vrot.lane.b32.xlu2 %v1763_v57, %s1435_s9 }
  0x80   : > { %662 = vrot.lane.b32.xlu1 %v1622_v45, %s1436_s10  ;;  %646 = vrot.lane.b32.xlu0 %v1571_v22, %s1436_s10 }
  0x81   : > { %v1783_v18 = vpop.permute.xlu2 %454 }
  0x82   : > { %2275 = vst [vmem:[#allocation9_spill] sm:$0xff] %v1783_v18 }
  0x87   : > { %696 = vrot.lane.b32.xlu2 %v436_v31, %s1436_s10 }
  0x88   : > { %680 = vrot.lane.b32.xlu1 %v416_v32, %s1436_s10  ;;  %594 = vrot.lane.b32.xlu0 %v1766_v62, %s1435_s9 }
  0x89   : > { %v1792_v22 = vpop.permute.xlu2 %460 }
  0x8f   : > { %482 = vrot.lane.b32.xlu2 %v413_v56, %s1434_s8 }
  0x90   : > { %562 = vrot.lane.b32.xlu1 %v1641_v52, %s1435_s9  ;;  %546 = vrot.lane.b32.xlu0 %v1529_v0, %s1435_s9 }
  0x91   : > { %v1799_v45 = vpop.permute.xlu2 %466 }
  0x92   : > { %v1801_v33 = vpop.permute.xlu1 %448  ;;  %v445_v38 = vpop.permute.xlu0 %444 }
  0x97   : > { %664 = vrot.lane.b32.xlu2 %v1660_v60, %s1436_s10  ;;  %v418_v60 = vsel %vm363_vm0, %v415_v19, %v417_v41 }
  0x98   : > { %648 = vrot.lane.b32.xlu1 %v1554_v13, %s1436_s10  ;;  %498 = vrot.lane.b32.xlu0 %v433_v55, %s1434_s8  ;;  %v839_v13 = vld [vmem:[%s2260_s2] sm:$0xff]  ;;  %v437_v55 = vrot.slane %v308_v16, 1  ;;  %v1853_v16 = vld [vmem:[%s1526_s7 + $0x168] sm:$0xff] }
  0x99   : > { %v1812_v43 = vpop.permute.xlu2 %472  ;;  %957 = vmatpush.msra.mxu0 %v839_v13  ;;  %1290 = vmatpush.msra.mxu2 %v839_v13  ;;  %2280 = vst [vmem:[#allocation14_spill] sm:$0xff] %v1853_v16 }
  0x9a   : > { %2276 = vst [vmem:[#allocation10_spill] sm:$0xff] %v1812_v43  ;;  %v1814_v51 = vpop.permute.xlu1 %450  ;;  %v1816_v53 = vpop.permute.xlu0 %446  ;;  %1291 = vmatpush.msra.mxu3 %v839_v13  ;;  %1289 = vmatpush.msra.mxu1 %v839_v13  ;;  %v438_v10 = vsel %vm363_vm0, %v435_v9, %v437_v55  ;;  %v1856_v55 = vld [vmem:[%s1526_s7 + $0x108] sm:$0xff]  ;;  %v1862_v43 = vld [vmem:[%s1526_s7 + $0x110] sm:$0xff] }
  0x9b   : > { %2281 = vst [vmem:[#allocation15_spill] sm:$0xff] %v1856_v55 }
  0x9f   : > { %682 = vrot.lane.b32.xlu2 %v418_v60, %s1436_s10 }
  0xa0   : > { %596 = vrot.lane.b32.xlu1 %v1769_v3, %s1435_s9  ;;  %580 = vrot.lane.b32.xlu0 %v1772_v4, %s1435_s9 }
  0xa1   : > { %v1828_v54 = vpop.permute.xlu2 %478 }
  0xa2   : > { %v1830_v56 = vpop.permute.xlu1 %458  ;;  %v1832_v6 = vpop.permute.xlu0 %456 }
  0xa3   : > { %2277 = vst [vmem:[#allocation11_spill] sm:$0xff] %v1830_v56  ;;  %v1859_v56 = vld [vmem:[%s1526_s7 + $0x170] sm:$0xff] }
  0xa4   : > { %2278 = vst [vmem:[#allocation12_spill] sm:$0xff] %v1832_v6  ;;  %v419_v6 = vrot.slane %v1856_v55, 1  ;;  %v440_v18 = vrot.slane %v1859_v56, 1 }
  0xa7   : > { %564 = vrot.lane.b32.xlu2 %v1637_v50, %s1435_s9  ;;  %v420_v50 = vrot.slane %v1862_v43, 1 }
  0xa8   : > { %548 = vrot.lane.b32.xlu1 %v1532_v1, %s1435_s9  ;;  %698 = vrot.lane.b32.xlu0 %v438_v10, %s1436_s10 }
  0xa9   : > { %v591_v19 = vpop.permute.xlu2 %590 }
  0xaa   : > { %v1840_v40 = vpop.permute.xlu1 %464  ;;  %v1842_v41 = vpop.permute.xlu0 %462 }
  0xaf   : > { %650 = vrot.lane.b32.xlu2 %v1568_v21, %s1436_s10  ;;  %v741_v21 = vsel %vm740_vm1, %v1544_v7, %v445_v38 }
  0xb0   : > { %500 = vrot.lane.b32.xlu1 %v436_v31, %s1434_s8  ;;  %484 = vrot.lane.b32.xlu0 %v416_v32, %s1434_s8  ;;  %v439_v31 = vrot.slane %v1853_v16, 1 }
  0xb1   : > { %v543_v9 = vpop.permute.xlu2 %542 }
  0xb2   : > { %v1848_v42 = vpop.permute.xlu1 %470  ;;  %v1850_v13 = vpop.permute.xlu0 %468  ;;  %v774_v32 = vsel %vm773_vm2, %v741_v21, %v543_v9 }
  0xb3   : > { %2279 = vst [vmem:[#allocation13_spill] sm:$0xff] %v1848_v42 }
  0xb7   : > { %598 = vrot.lane.b32.xlu2 %v1853_v16, %s1435_s9  ;;  %v441_v16 = vsel %vm363_vm0, %v439_v31, %v440_v18 }
  0xb8   : > { %582 = vrot.lane.b32.xlu1 %v1856_v55, %s1435_s9  ;;  %666 = vrot.lane.b32.xlu0 %v1657_v59, %s1436_s10  ;;  %v421_v59 = vsel %vm363_vm0, %v419_v6, %v420_v50 }
  0xb9   : > { %v645_v1 = vpop.permute.xlu2 %644 }
  0xba   : > { %v477_v42 = vpop.permute.xlu1 %476  ;;  %v1877_v7 = vpop.permute.xlu0 %474  ;;  %v807_v38 = vsel %vm806_vm3, %v774_v32, %v645_v1 }
  0xbb   : > { %2282 = vst [vmem:[#allocation16_spill] sm:$0xff] %v1877_v7  ;;  %1248 = vmatmul.msk.f32.vlgmr.msra.gmra.mxu0 %vm845_vm4, %v807_v38  ;;  %v757_v6 = vsel %vm740_vm1, %v1667_v63, %v477_v42 }
  0xbf   : > { %550 = vrot.lane.b32.xlu2 %v1585_v28, %s1435_s9 }
  0xc0   : > { %700 = vrot.lane.b32.xlu1 %v441_v16, %s1436_s10  ;;  %684 = vrot.lane.b32.xlu0 %v421_v59, %s1436_s10 }
  0xc1   : > { %v593_v9 = vpop.permute.xlu2 %592 }
  0xc2   : > { %v575_v21 = vpop.permute.xlu1 %574  ;;  %v493_v55 = vpop.permute.xlu0 %492 }
  0xc3   : > { %v765_v1 = vsel %vm740_vm1, %v1688_v15, %v493_v55  ;;  %v790_v32 = vsel %vm773_vm2, %v757_v6, %v575_v21 }
  0xc4   : > { %v798_v28 = vsel %vm773_vm2, %v765_v1, %v591_v19 }
  0xc7   : > { %502 = vrot.lane.b32.xlu2 %v438_v10, %s1434_s8 }
  0xc8   : > { %486 = vrot.lane.b32.xlu1 %v418_v60, %s1434_s8  ;;  %566 = vrot.lane.b32.xlu0 %v1631_v48, %s1435_s9  ;;  %v311_v60 = vld [vmem:[%s1526_s7 + $0x178] sm:$0x1] }
  0xc9   : > { %v1895_v31 = vpop.permute.xlu2 %544  ;;  %v299_v48 = vld [vmem:[%s1526_s7 + $0x118] sm:$0x1]  ;;  %v442_v19 = vrot.slane %v311_v60, 1  ;;  %s2075_s7 = scalar_lea.vmem [#allocation2], %s1245_s6 }
  0xca   : > { %v693_v38 = vpop.permute.xlu1 %692  ;;  %v677_v7 = vpop.permute.xlu0 %676  ;;  %s1134_s13 = sshll.u32 %s2075_s7, 4  ;;  %s1135_s13 = int_to_ptr.vmem [resolvable:$true] %s1134_s13 }
  0xcb   : > { %v823_v55 = vsel %vm806_vm3, %v790_v32, %v677_v7  ;;  %v831_v10 = vsel %vm806_vm3, %v798_v28, %v693_v38  ;;  %v422_v7 = vrot.slane %v299_v48, 1  ;;  %v1914_v1 = vsel %vm363_vm0, %v440_v18, %v442_v19 }
  0xcc   : > { %1264 = vmatmul.msk.f32.vlgmr.msra.gmra.mxu2 %vm845_vm4, %v823_v55  ;;  %1272 = vmatmul.msk.f32.vlgmr.msra.gmra.mxu3 %vm845_vm4, %v831_v10 }
  0xcd   : > { %v1917_v6 = vsel %vm363_vm0, %v420_v50, %v422_v7 }
  0xcf   : > { %584 = vrot.lane.b32.xlu2 %v1862_v43, %s1435_s9 }
  0xd0   : > { %668 = vrot.lane.b32.xlu1 %v1654_v58, %s1436_s10  ;;  %652 = vrot.lane.b32.xlu0 %v1603_v36, %s1436_s10  ;;  %v749_v36 = vsel %vm740_vm1, %v1575_v24, %v1792_v22  ;;  %v758_v22 = vsel %vm740_vm1, %v1663_v61, %v1828_v54 }
  0xd1   : > { %v1911_v42 = vpop.permute.xlu2 %496 }
  0xd2   : > { %v495_v28 = vpop.permute.xlu1 %494  ;;  %v559_v21 = vpop.permute.xlu0 %558 }
  0xd3   : > { %v782_v58 = vsel %vm773_vm2, %v749_v36, %v559_v21  ;;  %v766_v38 = vsel %vm740_vm1, %v1691_v17, %v495_v28  ;;  %v312_v36 = vld [vmem:[%s1958_s26] sm:$0xff] }
  0xd4   : > { %v799_v7 = vsel %vm773_vm2, %v766_v38, %v593_v9 }
  0xd7   : > { %702 = vrot.lane.b32.xlu2 %v1914_v1, %s1436_s10 }
  0xd8   : > { %686 = vrot.lane.b32.xlu1 %v1917_v6, %s1436_s10  ;;  %600 = vrot.lane.b32.xlu0 %v1859_v56, %s1435_s9 }
  0xd9   : > { %v579_v48 = vpop.permute.xlu2 %578 }
  0xda   : > { %v577_v18 = vpop.permute.xlu1 %576  ;;  %v661_v32 = vpop.permute.xlu0 %660 }
  0xdb   : > { %v815_v50 = vsel %vm806_vm3, %v782_v58, %v661_v32  ;;  %v791_v10 = vsel %vm773_vm2, %v758_v22, %v577_v18  ;;  %v313_v58 = vld [vmem:[%s1958_s26 + $0x8] sm:$0xff] }
  0xdc   : > { %1256 = vmatmul.msk.f32.vlgmr.msra.gmra.mxu1 %vm845_vm4, %v815_v50  ;;  %v640_v32 = vrot.slane %v313_v58, 1 }
  0xdf   : > { %488 = vrot.lane.b32.xlu2 %v421_v59, %s1434_s8 }
  0xe0   : > { %568 = vrot.lane.b32.xlu1 %v1634_v49, %s1435_s9  ;;  %552 = vrot.lane.b32.xlu0 %v1581_v26, %s1435_s9 }
  0xe1   : > { %v697_v55 = vpop.permute.xlu2 %696 }
  0xe2   : > { %v695_v60 = vpop.permute.xlu1 %694  ;;  %v679_v19 = vpop.permute.xlu0 %678 }
  0xe3   : > { %v824_v28 = vsel %vm806_vm3, %v791_v10, %v679_v19  ;;  %v832_v59 = vsel %vm806_vm3, %v799_v7, %v695_v60 }
  0xe4   : > { %1265 = vmatmul.msk.f32.gmra.mxu2 %vm845_vm4, %v824_v28  ;;  %1273 = vmatmul.msk.f32.gmra.mxu3 %vm845_vm4, %v832_v59 }
  0xe7   : > { %670 = vrot.lane.b32.xlu2 %v1685_v14, %s1436_s10  ;;  %v750_v14 = vsel %vm740_vm1, %v1578_v25, %v1842_v41 }
  0xe8   : > { %654 = vrot.lane.b32.xlu1 %v1600_v35, %s1436_s10  ;;  %504 = vrot.lane.b32.xlu0 %v441_v16, %s1434_s8  ;;  %v742_v35 = vsel %vm740_vm1, %v1547_v8, %v1816_v53  ;;  %v639_v16 = vrot.slane %v312_v36, 1 }
  0xe9   : > { %v1953_v54 = vpop.permute.xlu2 %482  ;;  %v775_v50 = vsel %vm773_vm2, %v742_v35, %v1895_v31  ;;  %v767_v31 = vsel %vm740_vm1, %v1702_v20, %v1911_v42  ;;  %v751_v20 = vsel %vm740_vm1, %v1610_v39, %v1840_v40  ;;  %v743_v39 = vsel %vm740_vm1, %v1535_v2, %v1801_v33 }
  0xea   : > { %v481_v9 = vpop.permute.xlu1 %480  ;;  %v561_v21 = vpop.permute.xlu0 %560  ;;  %v641_v8 = vsel %vm363_vm0, %v639_v16, %v640_v32 }
  0xeb   : > { %v759_v53 = vsel %vm740_vm1, %v1705_v23, %v481_v9 }
  0xec   : > { %v792_v7 = vsel %vm773_vm2, %v759_v53, %v579_v48 }
  0xef   : > { %688 = vrot.lane.b32.xlu2 %v1708_v27, %s1436_s10  ;;  %v783_v27 = vsel %vm773_vm2, %v750_v14, %v561_v21 }
  0xf0   : > { %602 = vrot.lane.b32.xlu1 %v312_v36, %s1435_s9  ;;  %586 = vrot.lane.b32.xlu0 %v1688_v15, %s1435_s9 }
  0xf1   : > { %v665_v18 = vpop.permute.xlu2 %664 }
  0xf2   : > { %v663_v38 = vpop.permute.xlu1 %662  ;;  %v647_v22 = vpop.permute.xlu0 %646 }
  0xf3   : > { %v808_v15 = vsel %vm806_vm3, %v775_v50, %v647_v22  ;;  %v816_v10 = vsel %vm806_vm3, %v783_v27, %v663_v38 }
  0xf4   : > { %1249 = vmatmul.msk.f32.gmra.mxu0 %vm845_vm4, %v808_v15  ;;  %1257 = vmatmul.msk.f32.gmra.mxu1 %vm845_vm4, %v816_v10 }
  0xf7   : > { %570 = vrot.lane.b32.xlu2 %v1667_v63, %s1435_s9 }
  0xf8   : > { %554 = vrot.lane.b32.xlu1 %v1575_v24, %s1435_s9  ;;  %704 = vrot.lane.b32.xlu0 %v641_v8, %s1436_s10 }
  0xf9   : > { %v683_v41 = vpop.permute.xlu2 %682 }
  0xfa   : > { %v681_v60 = vpop.permute.xlu1 %680  ;;  %v595_v19 = vpop.permute.xlu0 %594 }
  0xfb   : > { %v800_v23 = vsel %vm773_vm2, %v767_v31, %v595_v19  ;;  %v825_v28 = vsel %vm806_vm3, %v792_v7, %v681_v60 }
  0xfc   : > { %1266 = vmatmul.msk.f32.gmra.mxu2 %vm845_vm4, %v825_v28  ;;  %v833_v24 = vsel %vm806_vm3, %v800_v23, %v697_v55 }
  0xfd   : > { %1274 = vmatmul.msk.f32.gmra.mxu3 %vm845_vm4, %v833_v24 }
  0xff   : > { %656 = vrot.lane.b32.xlu2 %v1597_v34, %s1436_s10  ;;  %v314_v34 = vld [vmem:[%s1958_s26 + $0x10] sm:$0x1] }
 0x100   : > { %506 = vrot.lane.b32.xlu1 %v1914_v1, %s1434_s8  ;;  %490 = vrot.lane.b32.xlu0 %v1917_v6, %s1434_s8  ;;  %v642_v1 = vrot.slane %v314_v34, 1  ;;  %s1285_s8 = sshll.u32 %s1424_s18, 8 }
 0x101   : > { %v565_v63 = vpop.permute.xlu2 %564  ;;  %s1133_s12 = scalar_lea.hbm %s2262_s4, %s1285_s8 }
 0x102   : > { %v563_v42 = vpop.permute.xlu1 %562  ;;  %v547_v48 = vpop.permute.xlu0 %546  ;;  %s1136_s18 = sshll.u32 %s1133_s12, 4  ;;  %s1137_s18 = int_to_ptr.hbm [resolvable:$true] %s1136_s18 }
 0x103   : > { %v784_v55 = vsel %vm773_vm2, %v751_v20, %v563_v42  ;;  %v776_v6 = vsel %vm773_vm2, %v743_v39, %v547_v48  ;;  %v753_v20 = vsel %vm740_vm1, %v1641_v52, %v1850_v13  ;;  %s1368_s21 = sshra.s32 %s1137_s18, 4  ;;  %s1369_s21 = int_to_ptr.hbm [resolvable:$true] %s1368_s21 }
 0x104   : > { %v817_v59 = vsel %vm806_vm3, %v784_v55, %v665_v18  ;;  %s1370_s22 = scalar_lea.hbm %s1369_s21, 256  ;;  %p1375_p1 = scmp.lt.s32.totalorder %s1369_s21, %s2262_s4 }
 0x105   : > { %1258 = vmatmul.msk.f32.gmra.mxu1 %vm845_vm4, %v817_v59  ;;  %p1371_p12 = scmp.ne.s32.totalorder %s1369_s21, %s1370_s22  ;;  %p1376_p2 = scmp.lt.s32.totalorder %s1374_s30, %s1370_s22 }
 0x107   : > { %604 = vrot.lane.b32.xlu2 %v313_v58, %s1435_s9  ;;  %v643_v58 = vsel %vm363_vm0, %v640_v32, %v642_v1  ;;  %p1372_p13 = pnand %p1371_p12, %p1503_p4  ;;  %p1377_p3 = por %p1376_p2, %p1375_p1 }
 0x108   : > { %588 = vrot.lane.b32.xlu1 %v1691_v17, %s1435_s9  ;;  %672 = vrot.lane.b32.xlu0 %v1682_v12, %s1436_s10  ;;  %v760_v12 = vsel %vm740_vm1, %v1714_v30, %v1953_v54  ;;  %v744_v30 = vsel %vm740_vm1, %v1540_v5, %v1814_v51  ;;  %v752_v5 = vsel %vm740_vm1, %v1606_v37, %v1799_v45 }
 0x109   : > { %v651_v40 = vpop.permute.xlu2 %650  ;;  %v785_v51 = vsel %vm773_vm2, %v752_v5, %v565_v63  ;;  %v745_v63 = vsel %vm740_vm1, %v1529_v0, %v1760_v46  ;;  %p1373_p0 = pneg %p1372_p13 }
 0x10a   : > { %v649_v9 = vpop.permute.xlu1 %648  ;;  %v499_v21 = vpop.permute.xlu0 %498 }
 0x10b   : > { %v809_v36 = vsel %vm806_vm3, %v776_v6, %v649_v9  ;;  %p1378_p5 = pnand %p1377_p3, %p1373_p0 }
 0x10c   : > { %1250 = vmatmul.msk.f32.gmra.mxu0 %vm845_vm4, %v809_v36 }
 0x10f   : > { %556 = vrot.lane.b32.xlu2 %v1578_v25, %s1435_s9  ;;  %v768_v25 = vsel %vm740_vm1, %v1711_v29, %v499_v21 }
 0x110   : > { %706 = vrot.lane.b32.xlu1 %v643_v58, %s1436_s10  ;;  %690 = vrot.lane.b32.xlu0 %v1734_v44, %s1436_s10 }
 0x111   : > { %v599_v2 = vpop.permute.xlu2 %598 }
 0x112   : > { %v597_v17 = vpop.permute.xlu1 %596  ;;  %v581_v33 = vpop.permute.xlu0 %580 }
 0x113   : > { %v793_v35 = vsel %vm773_vm2, %v760_v12, %v581_v33  ;;  %v801_v44 = vsel %vm773_vm2, %v768_v25, %v597_v17  ;;  %v2283_v12 = vld [vmem:[#allocation13_spill] sm:$0xff]  ;;  %v2284_v17 = vld [vmem:[#allocation8_spill] sm:$0xff] }
 0x114   : > { %v826_v14 = vsel %vm806_vm3, %v793_v35, %v683_v41  ;;  %v754_v33 = vsel %vm740_vm1, %v2284_v17, %v2283_v12 }
 0x115   : > { %1267 = vmatmul.msk.f32.gmra.mxu2 %vm845_vm4, %v826_v14 }
 0x117   : > { %674 = vrot.lane.b32.xlu2 %v1679_v11, %s1436_s10 }
 0x118   : > { %658 = vrot.lane.b32.xlu1 %v1628_v47, %s1436_s10  ;;  %572 = vrot.lane.b32.xlu0 %v1663_v61, %s1435_s9 }
 0x119   : > { %v551_v18 = vpop.permute.xlu2 %550 }
 0x11a   : > { %v549_v54 = vpop.permute.xlu1 %548  ;;  %v699_v16 = vpop.permute.xlu0 %698  ;;  %v778_v42 = vsel %vm773_vm2, %v745_v63, %v551_v18  ;;  %v2285_v18 = vld [vmem:[#allocation9_spill] sm:$0xff] }
 0x11b   : > { %v777_v11 = vsel %vm773_vm2, %v744_v30, %v549_v54  ;;  %v834_v32 = vsel %vm806_vm3, %v801_v44, %v699_v16 }
 0x11c   : > { %1275 = vmatmul.msk.f32.gmra.mxu3 %vm845_vm4, %v834_v32  ;;  %v810_v47 = vsel %vm806_vm3, %v777_v11, %v651_v40  ;;  %v2286_v11 = vld [vmem:[#allocation5_spill] sm:$0xff] }
 0x11d   : > { %1251 = vmatmul.msk.f32.gmra.mxu0 %vm845_vm4, %v810_v47  ;;  %v746_v32 = vsel %vm740_vm1, %v2286_v11, %v2285_v18 }
 0x121   : > { %v503_v50 = vpop.permute.xlu2 %502 }
 0x122   : > { %v501_v61 = vpop.permute.xlu1 %500  ;;  %v485_v29 = vpop.permute.xlu0 %484  ;;  %v770_v52 = vsel %vm740_vm1, %v1769_v3, %v503_v50 }
 0x123   : > { %v769_v15 = vsel %vm740_vm1, %v1766_v62, %v501_v61  ;;  %v761_v8 = vsel %vm740_vm1, %v1763_v57, %v485_v29  ;;  %v2070_v62 = vld [vmem:[%s2261_s3] ss:$0 sm:$0xff] }
 0x124   : > { %v802_v41 = vsel %vm773_vm2, %v769_v15, %v599_v2 }
 0x129   : > { %v585_v10 = vpop.permute.xlu2 %584 }
 0x12a   : > { %v583_v27 = vpop.permute.xlu1 %582  ;;  %v667_v38 = vpop.permute.xlu0 %666 }
 0x12b   : > { %v818_v22 = vsel %vm806_vm3, %v785_v51, %v667_v38  ;;  %v794_v53 = vsel %vm773_vm2, %v761_v8, %v583_v27 }
 0x12c   : > { %1259 = vmatmul.msk.f32.gmra.mxu1 %vm845_vm4, %v818_v22  ;;  %v2287_v22 = vld [vmem:[#allocation15_spill] sm:$0xff] }
 0x131   : > { %v703_v19 = vpop.permute.xlu2 %702 }
 0x132   : > { %v701_v37 = vpop.permute.xlu1 %700  ;;  %v685_v45 = vpop.permute.xlu0 %684 }
 0x133   : > { %v827_v31 = vsel %vm806_vm3, %v794_v53, %v685_v45  ;;  %v835_v60 = vsel %vm806_vm3, %v802_v41, %v701_v37 }
 0x134   : > { %1268 = vmatmul.msk.f32.gmra.mxu2 %vm845_vm4, %v827_v31  ;;  %1276 = vmatmul.msk.f32.gmra.mxu3 %vm845_vm4, %v835_v60 }
 0x138   : > { %v959_v57 = vpop.f32.mrf.mxu0 }
 0x139   : > { %v960_v7 = vadd.f32 %v2070_v62, %v959_v57  ;;  %v489_v34 = vpop.permute.xlu2 %488  ;;  %v2288_v57 = vld [vmem:[#allocation14_spill] sm:$0xff] }
 0x13a   : > { %v487_v23 = vpop.permute.xlu1 %486  ;;  %v567_v28 = vpop.permute.xlu0 %566  ;;  %v763_v15 = vsel %vm740_vm1, %v2287_v22, %v489_v34 }
 0x13b   : > { %v1055_v24 = vmax.f32 %v960_v7, 0.0  ;;  %v786_v48 = vsel %vm773_vm2, %v753_v20, %v567_v28  ;;  %v762_v0 = vsel %vm740_vm1, %v1772_v4, %v487_v23  ;;  %v2289_v7 = vld [vmem:[#allocation12_spill] sm:$0xff]  ;;  %v2290_v23 = vld [vmem:[#allocation6_spill] sm:$0xff] }
 0x13c   : > { %v795_v1 = vsel %vm773_vm2, %v762_v0, %v585_v10  ;;  %v747_v28 = vsel %vm740_vm1, %v2290_v23, %v2289_v7 }
 0x13d   : > { %1087 = vst [vmem:[%s2075_s7] sm:$0xff] %v1055_v24 }
 0x141   : > { %v671_v36 = vpop.permute.xlu2 %670 }
 0x142   : > { %v669_v55 = vpop.permute.xlu1 %668  ;;  %v653_v59 = vpop.permute.xlu0 %652 }
 0x143   : > { %v811_v39 = vsel %vm806_vm3, %v778_v42, %v653_v59  ;;  %v819_v40 = vsel %vm806_vm3, %v786_v48, %v669_v55 }
 0x144   : > { %1252 = vmatmul.msk.f32.gmra.mxu0 %vm845_vm4, %v811_v39  ;;  %1260 = vmatmul.msk.f32.gmra.mxu1 %vm845_vm4, %v819_v40 }
 0x149   : > { %v689_v16 = vpop.permute.xlu2 %688 }
 0x14a   : > { %v687_v46 = vpop.permute.xlu1 %686  ;;  %v601_v13 = vpop.permute.xlu0 %600 }
 0x14b   : > { %v803_v6 = vsel %vm773_vm2, %v770_v52, %v601_v13  ;;  %v828_v9 = vsel %vm806_vm3, %v795_v1, %v687_v46 }
 0x14c   : > { %1269 = vmatmul.msk.f32.gmra.mxu2 %vm845_vm4, %v828_v9  ;;  %v836_v21 = vsel %vm806_vm3, %v803_v6, %v703_v19 }
 0x14d   : > { %1277 = vmatmul.msk.f32.gmra.mxu3 %vm845_vm4, %v836_v21 }
 0x14f   : > { %v1007_v4 = vpop.f32.mrf.mxu2  ;;  %v1031_v58 = vpop.f32.mrf.mxu3 }
 0x150   : > { %v1008_v3 = vadd.f32 %v2070_v62, %v1007_v4  ;;  %v1032_v2 = vadd.f32 %v2070_v62, %v1031_v58  ;;  %v2292_v4 = vld [vmem:[#allocation7_spill] sm:$0xff] }
 0x151   : > { %v571_v38 = vpop.permute.xlu2 %570 }
 0x152   : > { %v1071_v35 = vmax.f32 %v1008_v3, 0.0  ;;  %v1079_v14 = vmax.f32 %v1032_v2, 0.0  ;;  %v569_v25 = vpop.permute.xlu1 %568  ;;  %v553_v30 = vpop.permute.xlu0 %552 }
 0x153   : > { %v787_v44 = vsel %vm773_vm2, %v754_v33, %v569_v25  ;;  %v779_v61 = vsel %vm773_vm2, %v746_v32, %v553_v30 }
 0x154   : > { %1103 = vst [vmem:[%s2075_s7 + $0x80] sm:$0xff] %v1071_v35  ;;  %v820_v54 = vsel %vm806_vm3, %v787_v44, %v671_v36  ;;  %v2291_v36 = vld [vmem:[#allocation10_spill] sm:$0xff] }
 0x155   : > { %1111 = vst [vmem:[%s2075_s7 + $0xc0] sm:$0xff] %v1079_v14  ;;  %1261 = vmatmul.msk.f32.gmra.mxu1 %vm845_vm4, %v820_v54  ;;  %v755_v58 = vsel %vm740_vm1, %v2292_v4, %v2291_v36 }
 0x156   : > { %v788_v3 = vsel %vm773_vm2, %v755_v58, %v571_v38 }
 0x159   : > { %v983_v47 = vpop.f32.mrf.mxu1  ;;  %v657_v55 = vpop.permute.xlu2 %656 }
 0x15a   : > { %v984_v29 = vadd.f32 %v2070_v62, %v983_v47  ;;  %v655_v50 = vpop.permute.xlu1 %654  ;;  %v505_v5 = vpop.permute.xlu0 %504 }
 0x15b   : > { %v812_v51 = vsel %vm806_vm3, %v779_v61, %v655_v50  ;;  %v771_v19 = vsel %vm740_vm1, %v2288_v57, %v505_v5 }
 0x15c   : > { %v1063_v27 = vmax.f32 %v984_v29, 0.0  ;;  %1253 = vmatmul.msk.f32.gmra.mxu0 %vm845_vm4, %v812_v51  ;;  %v2293_v51 = vld [vmem:[#allocation11_spill] sm:$0xff] }
 0x15e   : > { %1095 = vst [vmem:[%s2075_s7 + $0x40] sm:$0xff] %v1063_v27  ;;  %v748_v27 = vsel %vm740_vm1, %v1581_v26, %v2293_v51 }
 0x161   : > { %v605_v21 = vpop.permute.xlu2 %604 }
 0x162   : > { %v603_v10 = vpop.permute.xlu1 %602  ;;  %v587_v8 = vpop.permute.xlu0 %586 }
 0x163   : > { %v796_v53 = vsel %vm773_vm2, %v763_v15, %v587_v8  ;;  %v804_v24 = vsel %vm773_vm2, %v771_v19, %v603_v10 }
 0x164   : > { %v829_v37 = vsel %vm806_vm3, %v796_v53, %v689_v16  ;;  %v2294_v53 = vld [vmem:[#allocation16_spill] sm:$0xff] }
 0x165   : > { %1270 = vmatmul.msk.f32.gmra.mxu2 %vm845_vm4, %v829_v37  ;;  %v756_v37 = vsel %vm740_vm1, %v1634_v49, %v2294_v53 }
 0x167   : > { %v1010_v45 = vpop.f32.mrf.mxu2  ;;  %v1034_v41 = vpop.f32.mrf.mxu3 }
 0x168   : > { %v1011_v31 = vadd.f32 %v2070_v62, %v1010_v45  ;;  %v1035_v60 = vadd.f32 %v2070_v62, %v1034_v41 }
 0x169   : > { %v557_v30 = vpop.permute.xlu2 %556 }
 0x16a   : > { %v1072_v63 = vmax.f32 %v1011_v31, 0.0  ;;  %v1080_v20 = vmax.f32 %v1035_v60, 0.0  ;;  %v555_v42 = vpop.permute.xlu1 %554  ;;  %v705_v48 = vpop.permute.xlu0 %704  ;;  %v781_v22 = vsel %vm773_vm2, %v748_v27, %v557_v30 }
 0x16b   : > { %v780_v59 = vsel %vm773_vm2, %v747_v28, %v555_v42  ;;  %v837_v34 = vsel %vm806_vm3, %v804_v24, %v705_v48 }
 0x16c   : > { %1104 = vst [vmem:[%s2075_s7 + $0x88] sm:$0xff] %v1072_v63  ;;  %1278 = vmatmul.msk.f32.gmra.mxu3 %vm845_vm4, %v837_v34  ;;  %v813_v39 = vsel %vm806_vm3, %v780_v59, %v657_v55 }
 0x16d   : > { %1112 = vst [vmem:[%s2075_s7 + $0xc8] sm:$0xff] %v1080_v20  ;;  %1254 = vmatmul.msk.f32.gmra.mxu0 %vm845_vm4, %v813_v39 }
 0x171   : > { %v962_v40 = vpop.f32.mrf.mxu0  ;;  %v986_v0 = vpop.f32.mrf.mxu1 }
 0x172   : > { %v963_v52 = vadd.f32 %v2070_v62, %v962_v40  ;;  %v987_v46 = vadd.f32 %v2070_v62, %v986_v0  ;;  %v507_v13 = vpop.permute.xlu1 %506  ;;  %v491_v1 = vpop.permute.xlu0 %490 }
 0x173   : > { %v772_v33 = vsel %vm740_vm1, %v1859_v56, %v507_v13  ;;  %v764_v54 = vsel %vm740_vm1, %v1862_v43, %v491_v1  ;;  %v675_v8 = vpop.permute.xlu2 %674 }
 0x174   : > { %v1056_v6 = vmax.f32 %v963_v52, 0.0  ;;  %v1064_v9 = vmax.f32 %v987_v46, 0.0  ;;  %v805_v32 = vsel %vm773_vm2, %v772_v33, %v605_v21 }
 0x176   : > { %1088 = vst [vmem:[%s2075_s7 + $0x8] sm:$0xff] %v1056_v6 }
 0x177   : > { %1096 = vst [vmem:[%s2075_s7 + $0x48] sm:$0xff] %v1064_v9 }
 0x17a   : > { %v589_v2 = vpop.permute.xlu1 %588  ;;  %v673_v12 = vpop.permute.xlu0 %672 }
 0x17b   : > { %v821_v17 = vsel %vm806_vm3, %v788_v3, %v673_v12  ;;  %v797_v56 = vsel %vm773_vm2, %v764_v54, %v589_v2 }
 0x17c   : > { %1262 = vmatmul.msk.f32.gmra.mxu1 %vm845_vm4, %v821_v17 }
 0x17f   : > { %v1013_v35 = vpop.f32.mrf.mxu2 }
 0x180   : > { %v1014_v14 = vadd.f32 %v2070_v62, %v1013_v35  ;;  %v1037_v25 = vpop.f32.mrf.mxu3 }
 0x181   : > { %v1038_v44 = vadd.f32 %v2070_v62, %v1037_v25 }
 0x182   : > { %v1073_v16 = vmax.f32 %v1014_v14, 0.0  ;;  %v707_v18 = vpop.permute.xlu1 %706  ;;  %v989_v11 = vpop.f32.mrf.mxu1 }
 0x183   : > { %v1081_v47 = vmax.f32 %v1038_v44, 0.0  ;;  %v990_v61 = vadd.f32 %v2070_v62, %v989_v11  ;;  %v691_v29 = vpop.permute.xlu0 %690  ;;  %v838_v50 = vsel %vm806_vm3, %v805_v32, %v707_v18 }
 0x184   : > { %1105 = vst [vmem:[%s2075_s7 + $0x90] sm:$0xff] %v1073_v16  ;;  %v830_v5 = vsel %vm806_vm3, %v797_v56, %v691_v29  ;;  %1279 = vmatmul.msk.f32.gmra.mxu3 %vm845_vm4, %v838_v50 }
 0x185   : > { %1113 = vst [vmem:[%s2075_s7 + $0xd0] sm:$0xff] %v1081_v47  ;;  %v1065_v43 = vmax.f32 %v990_v61, 0.0  ;;  %1271 = vmatmul.msk.f32.gmra.mxu2 %vm845_vm4, %v830_v5 }
 0x187   : > { %1097 = vst [vmem:[%s2075_s7 + $0x50] sm:$0xff] %v1065_v43 }
 0x189   : > { %v965_v38 = vpop.f32.mrf.mxu0 }
 0x18a   : > { %v966_v15 = vadd.f32 %v2070_v62, %v965_v38  ;;  %v659_v10 = vpop.permute.xlu1 %658 }
 0x18b   : > { %v573_v45 = vpop.permute.xlu0 %572  ;;  %v814_v41 = vsel %vm806_vm3, %v781_v22, %v659_v10 }
 0x18c   : > { %v1057_v31 = vmax.f32 %v966_v15, 0.0  ;;  %v789_v60 = vsel %vm773_vm2, %v756_v37, %v573_v45  ;;  %1255 = vmatmul.msk.f32.gmra.mxu0 %vm845_vm4, %v814_v41 }
 0x18d   : > { %v822_v26 = vsel %vm806_vm3, %v789_v60, %v675_v8 }
 0x18e   : > { %1089 = vst [vmem:[%s2075_s7 + $0x10] sm:$0xff] %v1057_v31  ;;  %1263 = vmatmul.msk.f32.gmra.mxu1 %vm845_vm4, %v822_v26 }
 0x198   : > { %v1016_v57 = vpop.f32.mrf.mxu2 }
 0x199   : > { %v1017_v19 = vadd.f32 %v2070_v62, %v1016_v57 }
 0x19a   : > { %v968_v49 = vpop.f32.mrf.mxu0 }
 0x19b   : > { %v1074_v7 = vmax.f32 %v1017_v19, 0.0  ;;  %v969_v23 = vadd.f32 %v2070_v62, %v968_v49 }
 0x19d   : > { %1106 = vst [vmem:[%s2075_s7 + $0x98] sm:$0xff] %v1074_v7  ;;  %v1058_v28 = vmax.f32 %v969_v23, 0.0 }
 0x19f   : > { %1090 = vst [vmem:[%s2075_s7 + $0x18] sm:$0xff] %v1058_v28  ;;  %v1040_v24 = vpop.f32.mrf.mxu3 }
 0x1a0   : > { %v1041_v63 = vadd.f32 %v2070_v62, %v1040_v24 }
 0x1a2   : > { %v1082_v20 = vmax.f32 %v1041_v63, 0.0 }
 0x1a4   : > { %1114 = vst [vmem:[%s2075_s7 + $0xd8] sm:$0xff] %v1082_v20 }
 0x1a9   : > { %v992_v42 = vpop.f32.mrf.mxu1 }
 0x1aa   : > { %v993_v48 = vadd.f32 %v2070_v62, %v992_v42 }
 0x1ac   : > { %v1066_v55 = vmax.f32 %v993_v48, 0.0 }
 0x1ae   : > { %1098 = vst [vmem:[%s2075_s7 + $0x58] sm:$0xff] %v1066_v55 }
 0x1b7   : > { %v1019_v59 = vpop.f32.mrf.mxu2  ;;  %v1043_v34 = vpop.f32.mrf.mxu3 }
 0x1b8   : > { %v1020_v39 = vadd.f32 %v2070_v62, %v1019_v59  ;;  %v1044_v40 = vadd.f32 %v2070_v62, %v1043_v34 }
 0x1ba   : > { %v1075_v0 = vmax.f32 %v1020_v39, 0.0  ;;  %v1083_v52 = vmax.f32 %v1044_v40, 0.0 }
 0x1bc   : > { %1107 = vst [vmem:[%s2075_s7 + $0xa0] sm:$0xff] %v1075_v0 }
 0x1bd   : > { %1115 = vst [vmem:[%s2075_s7 + $0xe0] sm:$0xff] %v1083_v52 }
 0x1c1   : > { %v971_v46 = vpop.f32.mrf.mxu0  ;;  %v995_v13 = vpop.f32.mrf.mxu1 }
 0x1c2   : > { %v972_v1 = vadd.f32 %v2070_v62, %v971_v46  ;;  %v996_v6 = vadd.f32 %v2070_v62, %v995_v13 }
 0x1c4   : > { %v1059_v9 = vmax.f32 %v972_v1, 0.0  ;;  %v1067_v21 = vmax.f32 %v996_v6, 0.0 }
 0x1c6   : > { %1091 = vst [vmem:[%s2075_s7 + $0x20] sm:$0xff] %v1059_v9 }
 0x1c7   : > { %1099 = vst [vmem:[%s2075_s7 + $0x60] sm:$0xff] %v1067_v21 }
 0x1cf   : > { %v1022_v36 = vpop.f32.mrf.mxu2 }
 0x1d0   : > { %v1023_v4 = vadd.f32 %v2070_v62, %v1022_v36  ;;  %v1046_v58 = vpop.f32.mrf.mxu3 }
 0x1d1   : > { %v1047_v3 = vadd.f32 %v2070_v62, %v1046_v58 }
 0x1d2   : > { %v1076_v2 = vmax.f32 %v1023_v4, 0.0  ;;  %v998_v12 = vpop.f32.mrf.mxu1 }
 0x1d3   : > { %v1084_v17 = vmax.f32 %v1047_v3, 0.0  ;;  %v999_v33 = vadd.f32 %v2070_v62, %v998_v12 }
 0x1d4   : > { %1108 = vst [vmem:[%s2075_s7 + $0xa8] sm:$0xff] %v1076_v2 }
 0x1d5   : > { %1116 = vst [vmem:[%s2075_s7 + $0xe8] sm:$0xff] %v1084_v17  ;;  %v1068_v35 = vmax.f32 %v999_v33, 0.0 }
 0x1d7   : > { %1100 = vst [vmem:[%s2075_s7 + $0x68] sm:$0xff] %v1068_v35 }
 0x1d9   : > { %v974_v14 = vpop.f32.mrf.mxu0 }
 0x1da   : > { %v975_v25 = vadd.f32 %v2070_v62, %v974_v14 }
 0x1dc   : > { %v1060_v30 = vmax.f32 %v975_v25, 0.0 }
 0x1de   : > { %1092 = vst [vmem:[%s2075_s7 + $0x28] sm:$0xff] %v1060_v30 }
 0x1e8   : > { %v1025_v44 = vpop.f32.mrf.mxu2 }
 0x1e9   : > { %v1026_v54 = vadd.f32 %v2070_v62, %v1025_v44 }
 0x1ea   : > { %v977_v16 = vpop.f32.mrf.mxu0 }
 0x1eb   : > { %v1077_v18 = vmax.f32 %v1026_v54, 0.0  ;;  %v978_v11 = vadd.f32 %v2070_v62, %v977_v16 }
 0x1ed   : > { %1109 = vst [vmem:[%s2075_s7 + $0xb0] sm:$0xff] %v1077_v18  ;;  %v1061_v32 = vmax.f32 %v978_v11, 0.0 }
 0x1ef   : > { %1093 = vst [vmem:[%s2075_s7 + $0x30] sm:$0xff] %v1061_v32  ;;  %v1049_v56 = vpop.f32.mrf.mxu3 }
 0x1f0   : > { %v1050_v47 = vadd.f32 %v2070_v62, %v1049_v56 }
 0x1f2   : > { %v1085_v61 = vmax.f32 %v1050_v47, 0.0 }
 0x1f4   : > { %1117 = vst [vmem:[%s2075_s7 + $0xf0] sm:$0xff] %v1085_v61 }
 0x1f9   : > { %v1001_v29 = vpop.f32.mrf.mxu1 }
 0x1fa   : > { %v1002_v50 = vadd.f32 %v2070_v62, %v1001_v29 }
 0x1fc   : > { %v1069_v5 = vmax.f32 %v1002_v50, 0.0 }
 0x1fe   : > { %1101 = vst [vmem:[%s2075_s7 + $0x70] sm:$0xff] %v1069_v5 }
 0x207   : > { %v1052_v43 = vpop.f32.mrf.mxu3 }
 0x208   : > { %v1028_v51 = vpop.f32.mrf.mxu2  ;;  %v1053_v27 = vadd.f32 %v2070_v62, %v1052_v43 }
 0x209   : > { %v1029_v38 = vadd.f32 %v2070_v62, %v1028_v51  ;;  %v980_v22 = vpop.f32.mrf.mxu0 }
 0x20a   : > { %v1086_v15 = vmax.f32 %v1053_v27, 0.0  ;;  %v981_v10 = vadd.f32 %v2070_v62, %v980_v22 }
 0x20b   : > { %v1078_v8 = vmax.f32 %v1029_v38, 0.0  ;;  %v1004_v53 = vpop.f32.mrf.mxu1 }
 0x20c   : > { %1118 = vst [vmem:[%s2075_s7 + $0xf8] sm:$0xff] %v1086_v15  ;;  %v1062_v37 = vmax.f32 %v981_v10, 0.0  ;;  %v1005_v45 = vadd.f32 %v2070_v62, %v1004_v53 }
 0x20d   : > { %1110 = vst [vmem:[%s2075_s7 + $0xb8] sm:$0xff] %v1078_v8 }
 0x20e   : > { %1094 = vst [vmem:[%s2075_s7 + $0x38] sm:$0xff] %v1062_v37  ;;  %v1070_v41 = vmax.f32 %v1005_v45, 0.0 }
 0x210   : > { %1102 = vst [vmem:[%s2075_s7 + $0x78] sm:$0xff] %v1070_v41 }
 0x211   : > { %1381 = shalt.err (!%p1378_p5)
}
 0x212   : > { %s1437_s29 = smov 128  }
 0x213   : > { %1294 = dma.vmem_to_hbm [thread:$0]  (%p1503_p4), %s1135_s13, 4096, %s1137_s18, %s1120_s14, %s1437_s29, %s1437_s29, %s1435_s9  }
 0x214 PF: > { %p1300_p6 = scmp.ge.s32.totalorder %s1432_s20, 2  ;;  %s1151_s7 = sand.u32 1, %s1412_s15  }
 0x215   : > { %s1152_s8 = scalar_lea.sflag [#allocation3], %s1151_s7 }
 0x216   : > { %p1297_p7 = pnand %p1300_p6, %p1510_p8 }
 0x218   : > { %p1298_p9 = pneg %p1297_p7 }
 0x21a   : > { %1407 = dma.done.wait (%p1298_p9), %s1152_s8, 4096  }
 0x21b   : > { %1409 = vsyncadd (%p1298_p9), %s1152_s8, 4294963200  ;;  %s17_s20 = sadd.s32 1, %s1432_s20   ;;  %s2295_s15 = smov %s1416_s16 }
 0x21c   : > { %p14_p10 = scmp.ge.s32.totalorder %s17_s20, 4   ;;  %s2296_s16 = smov %s1420_s17 }
 0x21d   : > { %s2297_s17 = smov %s1516_s28  ;;  %s2298_s18 = smov %s1428_s19 }
 0x21e   : > { %s2299_s19 = smov %s2301_s23  ;;  %16 = sbr.rel (!%p14_p10) target bundleno = 4 (0x4), region = 74 }
 0x223   :  { %1158 = vsyncpa [#allocation3], 1 }
 0x224   :  { %1160 = vsyncpa [#allocation3 + $0x1], 1 }

</bundles_post_ra>
